<compile_context>
chip_gen: v6e
topology: v6e:2x2x1
jax: 0.10.0
libtpu: 0.0.40
codegen_flags: <defaults>
</compile_context>

<pallas_src>
import functools

import jax
import jax.numpy as jnp
from jax.experimental import pallas as pl
from jax.experimental.pallas import tpu as pltpu


def _gap2d_kernel(x_ref, o_ref, *, inv_hw):
    # x_ref: (TB, TC, H*W) tile; o_ref: (TB, TC) tile.
    x = x_ref[...].astype(jnp.float32)
    s = jnp.sum(x, axis=-1)                        # dense lane reduction (XLU)
    o_ref[...] = (s * inv_hw).astype(o_ref.dtype)  # scale only the tiny result


def _round_up(x, m):
    return (x + m - 1) // m * m


def _pick_channel_tile(C, row_bytes, target_bytes):
    # Only split C when every tile stays a multiple of 128 (keeps the output
    # store lane-dense) and still divides C evenly.
    if C % 128 != 0:
        return C
    tc = C
    while tc % 256 == 0 and (tc // 2) * row_bytes >= target_bytes:
        tc //= 2
    return tc


def _pick_batch_tile(N, bytes_per_batch, target_bytes):
    # Batch several N per grid step when a single-batch tile is small.
    tb = 1
    while N % (tb * 2) == 0 and (tb * 2) * bytes_per_batch <= target_bytes:
        tb *= 2
    return tb


def global_average_pooling_2d(x):
    """Equivalent of torch.mean(x, dim=[2, 3], keepdim=False) for NCHW input."""
    assert x.ndim == 4, f"len(x.shape)={x.ndim!r}"
    N, C, H, W = x.shape
    HW = H * W
    itemsize = jnp.dtype(x.dtype).itemsize

    # Free view for contiguous NCHW: spatial dims collapse onto the lane axis.
    x3 = x.reshape(N, C, HW)

    target_bytes = 4 << 20  # ~4 MiB of input moved per grid step
    row_bytes = HW * itemsize
    tc = _pick_channel_tile(C, row_bytes, target_bytes)
    tb = _pick_batch_tile(N, tc * row_bytes, target_bytes)

    # Padded VMEM footprint of the double-buffered blocks -> explicit limit.
    in_block_bytes = tb * _round_up(tc, 8) * _round_up(HW, 128) * itemsize
    out_block_bytes = _round_up(tb, 8) * _round_up(tc, 128) * itemsize
    vmem_limit = 2 * in_block_bytes + 2 * out_block_bytes + (4 << 20)
    vmem_limit = max(32 << 20, min(vmem_limit, 64 << 20))
    # TODO(synk): if a single (tb, tc, H*W) tile cannot fit VMEM (huge spatial
    # maps with few channels), add an "arbitrary" grid axis over H*W chunks
    # with a (tb, tc) f32 VMEM accumulator instead of relying on the cap above.

    grid = (N // tb, C // tc)
    kernel = functools.partial(_gap2d_kernel, inv_hw=1.0 / float(HW))

    out = pl.pallas_call(
        kernel,
        out_shape=jax.ShapeDtypeStruct((N, C), x.dtype),
        grid_spec=pltpu.PrefetchScalarGridSpec(
            num_scalar_prefetch=0,
            grid=grid,
            in_specs=[
                pl.BlockSpec((tb, tc, HW), lambda i, j: (i, j, 0)),
            ],
            out_specs=pl.BlockSpec((tb, tc), lambda i, j: (i, j)),
        ),
        compiler_params=pltpu.CompilerParams(
            dimension_semantics=("parallel", "parallel"),
            vmem_limit_bytes=vmem_limit,
        ),
    )(x3)
    assert out.ndim == 2, f"len(out.shape)={out.ndim!r}"
    return out


if __name__ == "__main__":
    key = jax.random.PRNGKey(0)
    x = jax.random.normal(key, (2, 4, 16, 16), dtype=jnp.float32)

    y = global_average_pooling_2d(x)
    jax.block_until_ready(y)

    # Reference check against plain JAX.
    y_ref = jnp.mean(x, axis=(2, 3))
    assert y.shape == (2, 4), y.shape
    assert jnp.allclose(y, y_ref, atol=1e-5, rtol=1e-5)

    print("KERNEL_OK")
</pallas_src>

<mosaic_0001>
module attributes {stable_mosaic.version = 11 : i64} {
  func.func @_gap2d_kernel(%arg0: i32, %arg1: i32, %arg2: memref<2x4x256xf32, #tpu.memory_space<vmem>>, %arg3: memref<2x4xf32, #tpu.memory_space<vmem>>) attributes {dimension_semantics = [#tpu.dimension_semantics<parallel>, #tpu.dimension_semantics<parallel>], iteration_bounds = array<i64: 1, 1>, scalar_prefetch = 0 : i64, scratch_operands = 0 : i64, tpu.core_type = #tpu.core_type<tc>, window_params = [{transform_indices = @transform_0, window_bounds = array<i64: 2, 4, 256>}, {transform_indices = @transform_1, window_bounds = array<i64: 2, 4>}]} {
    %c0 = arith.constant 0 : index
    %c0_0 = arith.constant 0 : index
    %c0_1 = arith.constant 0 : index
    %0 = vector.load %arg2[%c0, %c0_0, %c0_1] : memref<2x4x256xf32, #tpu.memory_space<vmem>>, vector<2x4x256xf32>
    %cst = arith.constant dense<0.000000e+00> : vector<2x4xf32>
    %1 = vector.multi_reduction <add>, %0, %cst [2] : vector<2x4x256xf32> to vector<2x4xf32>
    %cst_2 = arith.constant 3.906250e-03 : f32
    %2 = vector.broadcast %cst_2 : f32 to vector<2x4xf32>
    %3 = arith.mulf %1, %2 : vector<2x4xf32>
    %c0_3 = arith.constant 0 : index
    %c0_4 = arith.constant 0 : index
    %4 = vector.load %arg3[%c0_3, %c0_4] : memref<2x4xf32, #tpu.memory_space<vmem>>, vector<2x4xf32>
    tpu.vector_store %arg3[%c0_3, %c0_4], %3 {strides = array<i32>} : memref<2x4xf32, #tpu.memory_space<vmem>>, vector<2x4xf32>,
    return
  }
  func.func @transform_0(%arg0: i32, %arg1: i32) -> (i32, i32, i32) {
    %c0_i32 = arith.constant 0 : i32
    %c0_i32_0 = arith.constant 0 : i32
    return %arg0, %arg1, %c0_i32 : i32, i32, i32
  }
  func.func @transform_1(%arg0: i32, %arg1: i32) -> (i32, i32) {
    %c0_i32 = arith.constant 0 : i32
    return %arg0, %arg1 : i32, i32
  }
}

</mosaic_0001>

<bundles_post_ra>
// kernel: tpu_custom_call.1
= control target key start
LH: loop header
LB: loop body
LE: loop exit
PB: predicated region body
PF: predicated region fallthrough
CT: control target
= control target key end

     0   :  { %6 = vsyncpa [#allocation3], 0  ;;  %s146_s0 = inlined_call_operand.hbm [shape: f32[2,4,256], index: 0, kind: input, shape index: {}]   ;;  %s147_s1 = inlined_call_operand.hbm [shape: f32[2,4], index: 1, kind: output, shape index: {}]  }
   0x1   :  { %7 = vsyncpa [#allocation4], 0  ;;  %s126_s6 = smov [#allocation2]  }
   0x2   :  { %s13_s7 = sshll.u32 %s126_s6, 4  ;;  %s14_s7 = int_to_ptr.vmem [resolvable:$true] %s13_s7 }
   0x3   :  { %s90_s8 = scalar_lea.vmem %s14_s7, 256  ;;  %p95_p1 = scmp.lt.s32.totalorder %s14_s7, %s14_s7 }
   0x4   :  { %p91_p0 = scmp.ne.s32.totalorder %s14_s7, %s90_s8  ;;  %p96_p2 = scmp.lt.s32.totalorder %s90_s8, %s90_s8 }
   0x6   :  { %p97_p3 = por %p96_p2, %p95_p1 }
   0x8   :  { %p98_p4 = pnand %p97_p3, %p91_p0 }
   0xa   :  { %101 = shalt.err (!%p98_p4)
}
   0xb   :  { %s127_s9 = smov 128   ;;  %s128_s10 = smov 8  }
   0xc   :  { %19 = dma.hbm_to_vmem [thread:$0]  %s146_s0, 256, %s14_s7, [#allocation3], %s127_s9, %s127_s9, %s128_s10  }
   0xd   :  { %122 = dma.done.wait [#allocation3], 256  }
   0xe   :  { %123 = vsyncadd [#allocation3], 4294967040  ;;  %vm31_vm0 = vcmask 1043456   ;;  %v23_v0 = vld [vmem:[#allocation2] sm:$0xff]  ;;  %v24_v1 = vld [vmem:[#allocation2 + $0x8] sm:$0xff]  ;;  %v46_v10 = vlaneseq  ;;  %s129_s0 = smov [#allocation5]  }
   0xf   :  { %v27_v2 = vcombine.high %v23_v0, %v23_v0  ;;  %v32_v3 = vsel %vm31_vm0, %v23_v0, 0.0  ;;  %v28_v4 = vcombine.high %v24_v1, %v24_v1  ;;  %v37_v6 = vsel %vm31_vm0, %v24_v1, 0.0  ;;  %s67_s13 = sshll.u32 %s129_s0, 4  ;;  %s68_s13 = int_to_ptr.vmem [resolvable:$true] %s67_s13 }
  0x10   :  { %v47_v11 = vand.u32 127, %v46_v10  ;;  %v49_v12 = vshrl.u32 %v46_v10, 7  ;;  %vm56_vm1 = vcmask 1041409   ;;  %vm59_vm2 = vcmask 25600   ;;  %s102_s14 = scalar_lea.vmem %s68_s13, 32  ;;  %p107_p6 = scmp.lt.s32.totalorder %s68_s13, %s68_s13 }
  0x11   :  { %v33_v5 = vsel %vm31_vm0, %v27_v2, 0.0  ;;  %v38_v7 = vsel %vm31_vm0, %v28_v4, 0.0  ;;  %p103_p5 = scmp.ne.s32.totalorder %s68_s13, %s102_s14  ;;  %p108_p7 = scmp.lt.s32.totalorder %s102_s14, %s102_s14 }
  0x12   :  { %v34_v8 = vadd.f32 %v33_v5, %v32_v3  ;;  %v39_v9 = vadd.f32 %v38_v7, %v37_v6  ;;  %v50_v14 = vsub.s32 %v47_v11, %v49_v12 }
  0x13   :  { %p109_p8 = por %p108_p7, %p107_p6 }
  0x14   :  { %35 = vadd.xlane.f32.xlu0 %v34_v8 }
  0x15   :  { %p110_p9 = pnand %p109_p8, %p103_p5 }
  0x18   :  { %40 = vadd.xlane.f32.xlu0 %v39_v9 }
  0x9d   :  { %v36_v13 = vpop.xlane.xlu0 %35 }
  0x9e   :  { %v42_v15 = vmul.f32 0.00390625, %v36_v13 }
  0xa0   :  { %v51_v18 = vrot.slane %v42_v15, %v50_v14 }
  0xa1   :  { %v41_v16 = vpop.xlane.xlu0 %40 }
  0xa2   :  { %v43_v17 = vmul.f32 0.00390625, %v41_v16 }
  0xa4   :  { %v55_v19 = vrot.slane %v43_v17, %v50_v14 }
  0xa6   :  { %v57_v20 = vsel %vm56_vm1, %v55_v19, %v51_v18 }
  0xa7   :  { %60 = vst.msk [vmem:[#allocation5] sm:$0x3] %vm59_vm2, %v57_v20 }
  0xa8   :  { %113 = shalt.err (!%p110_p9)
}
  0xa9   :  { %70 = dma.vmem_to_hbm [thread:$0]  %s68_s13, 32, %s147_s1, [#allocation4]  }
  0xaa   :  { %124 = dma.done.wait [#allocation4], 32  }
  0xab   :  { %125 = vsyncadd [#allocation4], 4294967264 }
  0xac   :  { %74 = vsyncpa [#allocation3], 1 }
  0xad   :  { %75 = vsyncpa [#allocation4], 1 }

</bundles_post_ra>
